<compile_context>
chip_gen: v7x
topology: tpu7x:2x2x1
jax: 0.10.0
libtpu: 0.0.40
codegen_flags: <defaults>
</compile_context>

<pallas_src>
import jax
import jax.numpy as jnp
from jax.experimental import pallas as pl
from jax.experimental.pallas import tpu as pltpu

LEAKY_SLOPE = 0.01  # PyTorch nn.LeakyReLU default negative_slope


def _leaky_relu(x):
    return jnp.where(x > 0, x, LEAKY_SLOPE * x)


def _round_up(x, m):
    return ((x + m - 1) // m) * m


# --------------------------------------------------------------------------
# Kernel: one batch tile; weights VMEM-resident; dueling combine pre-folded.
# --------------------------------------------------------------------------
def duel_net_kernel(x_ref, w12_ref, b12_ref, wq_ref, bq_ref, o_ref):
    # Stage 1 (fused lin_1 + lin_2): (TB, in) @ (in, 2H), f32 accumulate.
    h = jnp.dot(x_ref[...], w12_ref[...],
                preferred_element_type=jnp.float32) + b12_ref[...]
    h = _leaky_relu(h)                                    # elementwise in f32

    # Stage 2 (fused V/A heads + dueling combine, folded into W_q / b_q):
    # (TB, 2H) @ (2H, A) -> Q directly.  No epilogue reduce/broadcast needed.
    q = jnp.dot(h.astype(wq_ref.dtype), wq_ref[...],
                preferred_element_type=jnp.float32) + bq_ref[...]
    o_ref[...] = q.astype(o_ref.dtype)


# --------------------------------------------------------------------------
# Wrapper: folds weights, tiles the batch, launches the grid.
# --------------------------------------------------------------------------
def duel_net_forward(x, params, *, block_b=8192, min_tile_b=256,
                     compute_dtype=jnp.bfloat16):
    """params: w1,b1,wv,bv,w2,b2,wa,ba with weights stored as (in, out)."""
    B, in_size = x.shape
    H = params["w1"].shape[1]
    A = params["wa"].shape[1]

    # ---- fused + folded weights (matmul operands in compute_dtype, biases f32) ----
    w12 = jnp.concatenate([params["w1"], params["w2"]], axis=1).astype(compute_dtype)
    b12 = jnp.concatenate([params["b1"], params["b2"]], axis=1).astype(jnp.float32)

    wa_centered = params["wa"] - jnp.mean(params["wa"], axis=1, keepdims=True)
    wq = jnp.concatenate(
        [jnp.broadcast_to(params["wv"], (H, A)), wa_centered], axis=0
    ).astype(compute_dtype)                                          # (2H, A)
    bq = (params["bv"] + params["ba"]
          - jnp.mean(params["ba"], axis=1, keepdims=True)).astype(jnp.float32)

    # ---- batch tiling ----
    # Small batches: one tile (block == full dim, no (8,128) constraint).
    # Bigger batches: >= 2 parallel tiles (v7x has 2 TCs), tile a multiple of
    # 8, capped at block_b so per-step DMAs stay long but well inside VMEM
    # (x tile (8192, in) bf16 double-buffered is well under the 16/32 MiB
    # scoped default on every generation, including v7x's 64 MiB pool).
    if B < 2 * min_tile_b:
        tb = B
        b_pad = B
    else:
        tb = min(block_b, _round_up(pl.cdiv(B, 2), 8))
        b_pad = _round_up(B, tb)

    xp = x.astype(compute_dtype)
    if b_pad != B:
        xp = jnp.pad(xp, ((0, b_pad - B), (0, 0)))

    grid = (b_pad // tb,)
    itemsize = jnp.dtype(compute_dtype).itemsize
    cost = pl.CostEstimate(
        flops=2 * b_pad * (in_size * 2 * H + 2 * H * A),
        transcendentals=0,
        bytes_accessed=(xp.size * itemsize + w12.size * itemsize
                        + wq.size * itemsize + (b12.size + bq.size) * 4
                        + b_pad * A * 4),
    )

    out = pl.pallas_call(
        duel_net_kernel,
        out_shape=jax.ShapeDtypeStruct((b_pad, A), jnp.float32),
        grid_spec=pltpu.PrefetchScalarGridSpec(
            num_scalar_prefetch=0,
            grid=grid,
            in_specs=[
                pl.BlockSpec((tb, in_size), lambda i: (i, 0)),     # x tile
                pl.BlockSpec((in_size, 2 * H), lambda i: (0, 0)),  # W12 (resident)
                pl.BlockSpec((1, 2 * H), lambda i: (0, 0)),        # b12
                pl.BlockSpec((2 * H, A), lambda i: (0, 0)),        # W_q (resident)
                pl.BlockSpec((1, A), lambda i: (0, 0)),            # b_q
            ],
            out_specs=pl.BlockSpec((tb, A), lambda i: (i, 0)),
        ),
        compiler_params=pltpu.CompilerParams(
            dimension_semantics=("parallel",),
        ),
        cost_estimate=cost,
    )(xp, w12, b12, wq, bq)

    return out[:B] if b_pad != B else out


# --------------------------------------------------------------------------
# Parameter init (PyTorch nn.Linear-style, weights pre-transposed to (in, out))
# and a pure-JAX reference of the original forward.
# --------------------------------------------------------------------------
def init_params(key, in_size, hidden_size, n_actions):
    ks = jax.random.split(key, 8)

    def lin(kw, kb, fan_in, fan_out):
        bound = 1.0 / jnp.sqrt(jnp.float32(fan_in))
        w = jax.random.uniform(kw, (fan_in, fan_out), jnp.float32, -bound, bound)
        b = jax.random.uniform(kb, (1, fan_out), jnp.float32, -bound, bound)
        return w, b

    w1, b1 = lin(ks[0], ks[1], in_size, hidden_size)
    wv, bv = lin(ks[2], ks[3], hidden_size, 1)
    w2, b2 = lin(ks[4], ks[5], in_size, hidden_size)
    wa, ba = lin(ks[6], ks[7], hidden_size, n_actions)
    return dict(w1=w1, b1=b1, wv=wv, bv=bv, w2=w2, b2=b2, wa=wa, ba=ba)


def duel_net_ref(x, p):
    h1 = _leaky_relu(x @ p["w1"] + p["b1"])
    v = h1 @ p["wv"] + p["bv"]
    h2 = _leaky_relu(x @ p["w2"] + p["b2"])
    a = h2 @ p["wa"] + p["ba"]
    a = a - jnp.mean(a, axis=1, keepdims=True)
    return v + a


if __name__ == "__main__":
    key = jax.random.PRNGKey(0)
    k_x, k_p, k_x2 = jax.random.split(key, 3)

    # Small shapes consistent with the module: x is (batch, in_size).
    B, in_size, hidden_size, n_actions = 8, 32, 64, 4
    x = jax.random.normal(k_x, (B, in_size), jnp.float32)
    params = init_params(k_p, in_size, hidden_size, n_actions)

    # f32 path: same math as the PyTorch module (weight-side mean fold is a
    # reassociation; normal f32 tolerance applies).  Single grid step.
    out = jax.block_until_ready(
        duel_net_forward(x, params, compute_dtype=jnp.float32))
    ref = duel_net_ref(x, params)
    assert out.shape == (B, n_actions)
    assert jnp.allclose(out, ref, atol=1e-5, rtol=1e-5), "f32 mismatch vs reference"

    # Larger batch exercising the multi-tile "parallel" grid + padding path.
    B2 = 100
    x2 = jax.random.normal(k_x2, (B2, in_size), jnp.float32)
    out2 = jax.block_until_ready(
        duel_net_forward(x2, params, block_b=32, min_tile_b=16,
                         compute_dtype=jnp.float32))
    ref2 = duel_net_ref(x2, params)
    assert out2.shape == (B2, n_actions)
    assert jnp.allclose(out2, ref2, atol=1e-5, rtol=1e-5), "grid path mismatch"

    # Default bf16 compute path (f32 accumulate / f32 elementwise) — looser tol.
    out_bf16 = jax.block_until_ready(
        duel_net_forward(x2, params, block_b=32, min_tile_b=16))
    assert out_bf16.shape == (B2, n_actions)
    assert jnp.allclose(out_bf16, ref2, atol=1e-1, rtol=1e-1), "bf16 path mismatch"

    print("KERNEL_OK")
</pallas_src>

<mosaic_0001>
module attributes {stable_mosaic.version = 11 : i64} {
  func.func @duel_net_kernel(%arg0: i32, %arg1: memref<8x32xf32, #tpu.memory_space<vmem>>, %arg2: memref<32x128xf32, #tpu.memory_space<vmem>>, %arg3: memref<1x128xf32, #tpu.memory_space<vmem>>, %arg4: memref<128x4xf32, #tpu.memory_space<vmem>>, %arg5: memref<1x4xf32, #tpu.memory_space<vmem>>, %arg6: memref<8x4xf32, #tpu.memory_space<vmem>>) attributes {dimension_semantics = [#tpu.dimension_semantics<parallel>], iteration_bounds = array<i64: 1>, scalar_prefetch = 0 : i64, scratch_operands = 0 : i64, tpu.core_type = #tpu.core_type<tc>, window_params = [{transform_indices = @transform_0, window_bounds = array<i64: 8, 32>}, {pipeline_mode = #tpu.pipeline_mode<synchronous>, transform_indices = @transform_1, window_bounds = array<i64: 32, 128>}, {pipeline_mode = #tpu.pipeline_mode<synchronous>, transform_indices = @transform_2, window_bounds = array<i64: 1, 128>}, {pipeline_mode = #tpu.pipeline_mode<synchronous>, transform_indices = @transform_3, window_bounds = array<i64: 128, 4>}, {pipeline_mode = #tpu.pipeline_mode<synchronous>, transform_indices = @transform_4, window_bounds = array<i64: 1, 4>}, {transform_indices = @transform_5, window_bounds = array<i64: 8, 4>}]} {
    %c0 = arith.constant 0 : index
    %c0_0 = arith.constant 0 : index
    %0 = vector.load %arg1[%c0, %c0_0] : memref<8x32xf32, #tpu.memory_space<vmem>>, vector<8x32xf32>
    %c0_1 = arith.constant 0 : index
    %c0_2 = arith.constant 0 : index
    %1 = vector.load %arg2[%c0_1, %c0_2] : memref<32x128xf32, #tpu.memory_space<vmem>>, vector<32x128xf32>
    %cst = arith.constant dense<0.000000e+00> : vector<8x128xf32>
    %2 = tpu.matmul %0, %1, %cst {dimension_numbers = #tpu.dot_dimension_numbers<[1], [0], [0], [1], [0, 0, 1, 1], [], []>} : vector<8x32xf32>, vector<32x128xf32>, vector<8x128xf32> -> vector<8x128xf32>
    %c0_3 = arith.constant 0 : index
    %c0_4 = arith.constant 0 : index
    %3 = vector.load %arg3[%c0_3, %c0_4] : memref<1x128xf32, #tpu.memory_space<vmem>>, vector<1x128xf32>
    %4 = vector.broadcast %3 : vector<1x128xf32> to vector<8x128xf32>
    %5 = arith.addf %2, %4 : vector<8x128xf32>
    %cst_5 = arith.constant 0.000000e+00 : f32
    %6 = vector.broadcast %cst_5 : f32 to vector<8x128xf32>
    %7 = arith.cmpf ogt, %5, %6 : vector<8x128xf32>
    %cst_6 = arith.constant 0.00999999977 : f32
    %8 = vector.broadcast %cst_6 : f32 to vector<8x128xf32>
    %9 = arith.mulf %8, %5 : vector<8x128xf32>
    %10 = arith.select %7, %5, %9 : vector<8x128xi1>, vector<8x128xf32>
    %c0_7 = arith.constant 0 : index
    %c0_8 = arith.constant 0 : index
    %11 = vector.load %arg4[%c0_7, %c0_8] : memref<128x4xf32, #tpu.memory_space<vmem>>, vector<128x4xf32>
    %cst_9 = arith.constant dense<0.000000e+00> : vector<8x4xf32>
    %12 = tpu.matmul %10, %11, %cst_9 {dimension_numbers = #tpu.dot_dimension_numbers<[1], [0], [0], [1], [0, 0, 1, 1], [], []>} : vector<8x128xf32>, vector<128x4xf32>, vector<8x4xf32> -> vector<8x4xf32>
    %c0_10 = arith.constant 0 : index
    %c0_11 = arith.constant 0 : index
    %13 = vector.load %arg5[%c0_10, %c0_11] : memref<1x4xf32, #tpu.memory_space<vmem>>, vector<1x4xf32>
    %14 = vector.broadcast %13 : vector<1x4xf32> to vector<8x4xf32>
    %15 = arith.addf %12, %14 : vector<8x4xf32>
    %c0_12 = arith.constant 0 : index
    %c0_13 = arith.constant 0 : index
    %16 = vector.load %arg6[%c0_12, %c0_13] : memref<8x4xf32, #tpu.memory_space<vmem>>, vector<8x4xf32>
    tpu.vector_store %arg6[%c0_12, %c0_13], %15 {strides = array<i32>} : memref<8x4xf32, #tpu.memory_space<vmem>>, vector<8x4xf32>,
    return
  }
  func.func @transform_0(%arg0: i32) -> (i32, i32) {
    %c0_i32 = arith.constant 0 : i32
    %c0_i32_0 = arith.constant 0 : i32
    return %arg0, %c0_i32 : i32, i32
  }
  func.func @transform_1(%arg0: i32) -> (i32, i32) {
    %c0_i32 = arith.constant 0 : i32
    %c0_i32_0 = arith.constant 0 : i32
    %c0_i32_1 = arith.constant 0 : i32
    return %c0_i32, %c0_i32_0 : i32, i32
  }
  func.func @transform_2(%arg0: i32) -> (i32, i32) {
    %c0_i32 = arith.constant 0 : i32
    %c0_i32_0 = arith.constant 0 : i32
    %c0_i32_1 = arith.constant 0 : i32
    return %c0_i32, %c0_i32_0 : i32, i32
  }
  func.func @transform_3(%arg0: i32) -> (i32, i32) {
    %c0_i32 = arith.constant 0 : i32
    %c0_i32_0 = arith.constant 0 : i32
    %c0_i32_1 = arith.constant 0 : i32
    return %c0_i32, %c0_i32_0 : i32, i32
  }
  func.func @transform_4(%arg0: i32) -> (i32, i32) {
    %c0_i32 = arith.constant 0 : i32
    %c0_i32_0 = arith.constant 0 : i32
    %c0_i32_1 = arith.constant 0 : i32
    return %c0_i32, %c0_i32_0 : i32, i32
  }
  func.func @transform_5(%arg0: i32) -> (i32, i32) {
    %c0_i32 = arith.constant 0 : i32
    %c0_i32_0 = arith.constant 0 : i32
    return %arg0, %c0_i32 : i32, i32
  }
}

</mosaic_0001>

<bundles_post_ra>
// kernel: tpu_custom_call.1
= control target key start
LH: loop header
LB: loop body
LE: loop exit
PB: predicated region body
PF: predicated region fallthrough
CT: control target
= control target key end

     0   :  { %v312_v0 = vmov 0.0|0.0   ;;  %vm313_vm0 = vmmov 0   ;;  %v314_v4 = vmov 0.0   ;;  %vm32_vm1 = vcmask 261120   ;;  %s417_s1 = inlined_call_operand.vmem [shape: f32[32,128], index: 1, kind: input, shape index: {}]   ;;  %s418_s3 = inlined_call_operand.vmem [shape: f32[128,4], index: 3, kind: input, shape index: {}]   ;;  %s419_s0 = inlined_call_operand.vmem [shape: f32[8,32], index: 0, kind: input, shape index: {}]   ;;  %s420_s2 = inlined_call_operand.vmem [shape: f32[1,128], index: 2, kind: input, shape index: {}]   ;;  %s421_s4 = inlined_call_operand.vmem [shape: f32[1,4], index: 4, kind: input, shape index: {}]   ;;  %s422_s5 = inlined_call_operand.vmem [shape: f32[8,4], index: 5, kind: output, shape index: {}]  }
   0x1   :  { %279 = vmatprep.subr.bf16.mxu0 %v312_v0  ;;  %v21_v1 = vld [vmem:[%s417_s1] sm:$0xff]  ;;  %v22_v2 = vld [vmem:[%s417_s1 + $0x8] sm:$0xff]  ;;  %v23_v3 = vld [vmem:[%s417_s1 + $0x10] sm:$0xff]  ;;  %241 = vmatprep.mubr.msk.f32.mxu0 %vm313_vm0, %v314_v4  ;;  %vm202_vm3 = vcmask 31744  }
   0x2   :  { %v280_v5 = vpack.c.bf16 %v22_v2, %v21_v1  ;;  %v24_v6 = vld [vmem:[%s417_s1 + $0x18] sm:$0xff]  ;;  %285 = vmatprep.subr.bf16.mxu1 %v312_v0  ;;  %v109_v7 = vld [vmem:[%s418_s3] sm:$0xff]  ;;  %276 = vmatprep.mubr.msk.f32.mxu1 %vm313_vm0, %v314_v4  ;;  %v110_v8 = vld [vmem:[%s418_s3 + $0x8] sm:$0xff] }
   0x3   :  { %v111_v9 = vld [vmem:[%s418_s3 + $0x10] sm:$0xff]  ;;  %v112_v10 = vld [vmem:[%s418_s3 + $0x18] sm:$0xff]  ;;  %v283_v11 = vpack.c.bf16 %v24_v6, %v23_v3  ;;  %v286_v12 = vpack.c.bf16 %v110_v8, %v109_v7  ;;  %v113_v14 = vld [vmem:[%s418_s3 + $0x20] sm:$0xff] }
   0x4   :  { %281 = vmatpush3.bf16.msra.mxu0 %v280_v5  ;;  %v289_v13 = vpack.c.bf16 %v112_v10, %v111_v9  ;;  %v114_v15 = vld [vmem:[%s418_s3 + $0x28] sm:$0xff]  ;;  %v20_v16 = vld [vmem:[%s419_s0] sm:$0xff]  ;;  %v115_v18 = vld [vmem:[%s418_s3 + $0x30] sm:$0xff] }
   0x5   :  { %282 = vmatprep.subr.bf16.mxu0 %v312_v0  ;;  %287 = vmatpush3.bf16.msra.mxu1 %v286_v12  ;;  %v292_v17 = vpack.c.bf16 %v114_v15, %v113_v14  ;;  %v116_v19 = vld [vmem:[%s418_s3 + $0x38] sm:$0xff]  ;;  %v117_v21 = vld [vmem:[%s418_s3 + $0x40] sm:$0xff]  ;;  %v118_v22 = vld [vmem:[%s418_s3 + $0x48] sm:$0xff] }
   0x6   :  { %288 = vmatprep.subr.bf16.mxu1 %v312_v0  ;;  %v295_v20 = vpack.c.bf16 %v116_v19, %v115_v18  ;;  %v298_v23 = vpack.c.bf16 %v118_v22, %v117_v21  ;;  %v119_v24 = vld [vmem:[%s418_s3 + $0x50] sm:$0xff]  ;;  %v120_v25 = vld [vmem:[%s418_s3 + $0x58] sm:$0xff]  ;;  %v121_v27 = vld [vmem:[%s418_s3 + $0x60] sm:$0xff] }
   0x7   :  { %v301_v26 = vpack.c.bf16 %v120_v25, %v119_v24  ;;  %v122_v28 = vld [vmem:[%s418_s3 + $0x68] sm:$0xff]  ;;  %v123_v30 = vld [vmem:[%s418_s3 + $0x70] sm:$0xff]  ;;  %v124_v31 = vld [vmem:[%s418_s3 + $0x78] sm:$0xff] }
   0x8   :  { %284 = vmatpush3.bf16.msra.mxu0 %v283_v11  ;;  %v304_v29 = vpack.c.bf16 %v122_v28, %v121_v27  ;;  %v307_v32 = vpack.c.bf16 %v124_v31, %v123_v30  ;;  %v208_v33 = vld [vmem:[%s420_s2] ss:$0 sm:$0xff] }
   0x9   :  { %290 = vmatpush3.bf16.msra.mxu1 %v289_v13  ;;  %v210_v39 = vld [vmem:[%s421_s4] ss:$0 sm:$0xff] }
   0xa   :  { %291 = vmatprep.subr.bf16.mxu1 %v312_v0 }
   0xb   :  { %242 = vmatmul.mubr.msk.f32.vlgmr.msra.gmra.mrb[0].mxu0 %vm32_vm1, %v20_v16 }
   0xd   :  { %293 = vmatpush3.bf16.msra.mxu1 %v292_v17 }
   0xe   :  { %294 = vmatprep.subr.bf16.mxu1 %v312_v0 }
  0x11   :  { %296 = vmatpush3.bf16.msra.mxu1 %v295_v20 }
  0x12   :  { %297 = vmatprep.subr.bf16.mxu1 %v312_v0 }
  0x15   :  { %299 = vmatpush3.bf16.msra.mxu1 %v298_v23 }
  0x16   :  { %300 = vmatprep.subr.bf16.mxu1 %v312_v0 }
  0x19   :  { %302 = vmatpush3.bf16.msra.mxu1 %v301_v26 }
  0x1a   :  { %303 = vmatprep.subr.bf16.mxu1 %v312_v0 }
  0x1d   :  { %305 = vmatpush3.bf16.msra.mxu1 %v304_v29 }
  0x1e   :  { %306 = vmatprep.subr.bf16.mxu1 %v312_v0 }
  0x21   :  { %308 = vmatpush3.bf16.msra.mxu1 %v307_v32 }
  0xde   :  { %v102_v34 = vpop.f32.mrb[0].mxu0 }
  0xdf   :  { %v103_v35 = vadd.f32 %v208_v33, %v102_v34  ;;  %v243_v36 = vpop.f32.mrb[1].mxu0 }
  0xe1   :  { %v107_v37 = vmul.f32 0.01, %v103_v35  ;;  %vm106_vm2 = vcmp.gt.f32.partialorder %v103_v35, 0.0 }
  0xe3   :  { %v108_v38 = vsel %vm106_vm2, %v103_v35, %v107_v37 }
  0xe4   :  { %277 = vmatmul.mubr.f32.vlgmr.msra.gmra.mrb[0].mxu1 %v108_v38 }
 0x1b7   :  { %v198_v40 = vpop.f32.mrb[0].mxu1 }
 0x1b8   :  { %v199_v41 = vadd.f32 %v210_v39, %v198_v40  ;;  %v278_v42 = vpop.f32.mrb[1].mxu1 }
 0x1ba   :  { %203 = vst.msk [vmem:[%s422_s5] sm:$0xff] %vm202_vm3, %v199_v41 }

</bundles_post_ra>
